<compile_context>
chip_gen: v5e
topology: v5e:2x2
jax: 0.10.0
libtpu: 0.0.40
codegen_flags: <defaults>
</compile_context>

<pallas_src>
import functools

import jax
import jax.numpy as jnp
from jax import lax
from jax.experimental import pallas as pl
from jax.experimental.pallas import tpu as pltpu


def _waternet_kernel(x_ref,
                     w1_ref, b1_ref,
                     w2_ref, b2_ref,
                     w3_ref, b3_ref,
                     w4_ref, b4_ref,
                     w5_ref, b5_ref,
                     o_ref):
    """Fused 5-layer MLP.  x tile arrives native-layout (bt, in); all activations
    after layer 1 are (features, bt) = batch-on-lanes."""
    x = x_ref[...].astype(jnp.bfloat16)                               # (bt, in) bf16

    # Layer 1: contract the `in` axis of w1 (out,in) with the `in` axis of x (bt,in)
    # -> (64, bt).  Batch lands on the lane axis; no wrapper transpose needed.
    h = lax.dot_general(w1_ref[...], x,
                        dimension_numbers=(((1,), (1,)), ((), ())),
                        preferred_element_type=jnp.float32) + b1_ref[...]
    h = jnp.maximum(h, 0.0)                                           # (64, bt) f32

    # Layers 2-5: bf16 MXU inputs, f32 accumulate, f32 elementwise tail.
    h = jnp.dot(w2_ref[...], h.astype(jnp.bfloat16),
                preferred_element_type=jnp.float32) + b2_ref[...]
    h = jnp.maximum(h, 0.0)                                           # (32, bt)
    h = jnp.dot(w3_ref[...], h.astype(jnp.bfloat16),
                preferred_element_type=jnp.float32) + b3_ref[...]
    h = jnp.maximum(h, 0.0)                                           # (16, bt)
    h = jnp.dot(w4_ref[...], h.astype(jnp.bfloat16),
                preferred_element_type=jnp.float32) + b4_ref[...]
    h = jnp.maximum(h, 0.0)                                           # (8, bt)
    h = jnp.dot(w5_ref[...], h.astype(jnp.bfloat16),
                preferred_element_type=jnp.float32) + b5_ref[...]     # (1, bt)

    # Numerically stable sigmoid with a single EUP reciprocal.
    z = jnp.exp(-jnp.abs(h))
    inv = pl.reciprocal(1.0 + z, approx=True)
    o_ref[...] = jnp.where(h >= 0.0, inv, z * inv).astype(o_ref.dtype)  # (1, bt)


def _vmem_estimate_bytes(bt, input_size):
    x_blk = bt * input_size * 4                       # f32 x tile
    acts = (64 + 64 + 32 + 16 + 8 + 1) * bt * 4       # f32 intermediates (upper bound)
    out_blk = bt * 4
    w_bytes = 2 * (64 * input_size + 64 * 32 + 32 * 16 + 16 * 8 + 8) + \
              4 * (64 + 32 + 16 + 8 + 1)
    return 2 * (x_blk + out_blk) + acts + w_bytes     # double-buffered streams + temps


@functools.partial(jax.jit, static_argnames=("batch_tile",))
def waternet_forward(x, params, *, batch_tile=8192):
    """x: (B, input_size) float32 (native layout, no pre-transpose).
    params: list of (W, b) per layer; W is (out, in) [PyTorch layout], b is (out, 1).
    Returns (B, 1) float32 sigmoid outputs."""
    B, input_size = x.shape

    # Lane-dense batch tile: multiple of 128, grid padded to whole tiles.
    bt = min(batch_tile, B)
    bt = ((bt + 127) // 128) * 128
    n_steps = pl.cdiv(B, bt)
    B_pad = n_steps * bt
    if B_pad != B:
        x = jnp.pad(x, ((0, B_pad - B), (0, 0)))

    x = x.astype(jnp.float32)

    flat_params = []
    in_specs = [pl.BlockSpec((bt, input_size), lambda i: (i, 0))]      # native x layout
    for li, (w, b) in enumerate(params):
        wk = w.astype(jnp.bfloat16)                                    # bf16 MXU feed
        bk = b.astype(jnp.float32)                                     # f32 bias columns
        flat_params += [wk, bk]
        # Tiny full-array blocks with a constant index_map => resident in VMEM.
        in_specs.append(pl.BlockSpec(wk.shape, lambda i: (0, 0)))
        in_specs.append(pl.BlockSpec(bk.shape, lambda i: (0, 0)))

    flops = 2 * B_pad * (input_size * 64 + 64 * 32 + 32 * 16 + 16 * 8 + 8 * 1)
    bytes_accessed = (B_pad * input_size * 4 + B_pad * 4 +
                      sum(int(w.size) * 2 + int(b.size) * 4 for w, b in params))
    cost = pl.CostEstimate(flops=flops, transcendentals=2 * B_pad,
                           bytes_accessed=bytes_accessed)

    vmem_limit = min(48 << 20, max(32 << 20, 2 * _vmem_estimate_bytes(bt, input_size)))

    out = pl.pallas_call(
        _waternet_kernel,
        out_shape=jax.ShapeDtypeStruct((1, B_pad), jnp.float32),       # lane-dense output
        grid_spec=pltpu.PrefetchScalarGridSpec(
            num_scalar_prefetch=0,
            grid=(n_steps,),
            in_specs=in_specs,
            out_specs=pl.BlockSpec((1, bt), lambda i: (0, i)),
        ),
        compiler_params=pltpu.CompilerParams(
            dimension_semantics=("parallel",),
            vmem_limit_bytes=int(vmem_limit)),
        cost_estimate=cost,
    )(x, *flat_params)

    # (1, B_pad) row-major == B_pad contiguous values; reshape+slice is cheap.
    return out.reshape(-1)[:B].reshape(B, 1)


def init_waternet_params(input_size, key):
    """PyTorch nn.Linear-style init: U(-1/sqrt(fan_in), 1/sqrt(fan_in)).
    Weights kept in PyTorch (out, in) layout; biases stored as (out, 1) columns."""
    dims = [input_size, 64, 32, 16, 8, 1]
    params = []
    for fan_in, fan_out in zip(dims[:-1], dims[1:]):
        key, kw, kb = jax.random.split(key, 3)
        bound = 1.0 / jnp.sqrt(jnp.float32(fan_in))
        w = jax.random.uniform(kw, (fan_out, fan_in), jnp.float32, -bound, bound)
        b = jax.random.uniform(kb, (fan_out, 1), jnp.float32, -bound, bound)
        params.append((w, b))
    return params


def waternet_reference_f32(x, params):
    """Pure-JAX full-f32 reference matching the PyTorch module semantics."""
    h = x.astype(jnp.float32)
    for i, (w, b) in enumerate(params):
        h = h @ w.T + b.reshape(1, -1)
        if i < len(params) - 1:
            h = jnp.maximum(h, 0.0)
    return jax.nn.sigmoid(h)


if __name__ == "__main__":
    input_size = 16
    batch = 256          # small demo; batch_tile=128 keeps 2 grid steps (v7x's 2 TCs)

    key = jax.random.PRNGKey(0)
    key, kx = jax.random.split(key)
    x = jax.random.normal(kx, (batch, input_size), jnp.float32)

    params = init_waternet_params(input_size, key)

    out = waternet_forward(x, params, batch_tile=128)
    out = jax.block_until_ready(out)

    ref = waternet_reference_f32(x, params)
    assert out.shape == (batch, 1)
    # Loose tolerance: kernel uses bf16 MXU inputs + approx reciprocal vs full-f32 ref.
    assert jnp.allclose(out, ref, atol=2e-2, rtol=2e-2), (
        float(jnp.max(jnp.abs(out - ref))))

    print("KERNEL_OK")
</pallas_src>

<mosaic_0001>
module attributes {stable_mosaic.version = 11 : i64} {
  func.func @_waternet_kernel(%arg0: i32, %arg1: memref<128x16xf32, #tpu.memory_space<vmem>>, %arg2: memref<64x16xbf16, #tpu.memory_space<vmem>>, %arg3: memref<64x1xf32, #tpu.memory_space<vmem>>, %arg4: memref<32x64xbf16, #tpu.memory_space<vmem>>, %arg5: memref<32x1xf32, #tpu.memory_space<vmem>>, %arg6: memref<16x32xbf16, #tpu.memory_space<vmem>>, %arg7: memref<16x1xf32, #tpu.memory_space<vmem>>, %arg8: memref<8x16xbf16, #tpu.memory_space<vmem>>, %arg9: memref<8x1xf32, #tpu.memory_space<vmem>>, %arg10: memref<1x8xbf16, #tpu.memory_space<vmem>>, %arg11: memref<1x1xf32, #tpu.memory_space<vmem>>, %arg12: memref<1x128xf32, #tpu.memory_space<vmem>>) attributes {dimension_semantics = [#tpu.dimension_semantics<parallel>], iteration_bounds = array<i64: 2>, scalar_prefetch = 0 : i64, scratch_operands = 0 : i64, tpu.core_type = #tpu.core_type<tc>, window_params = [{transform_indices = @transform_0, window_bounds = array<i64: 128, 16>}, {pipeline_mode = #tpu.pipeline_mode<synchronous>, transform_indices = @transform_1, window_bounds = array<i64: 64, 16>}, {pipeline_mode = #tpu.pipeline_mode<synchronous>, transform_indices = @transform_2, window_bounds = array<i64: 64, 1>}, {pipeline_mode = #tpu.pipeline_mode<synchronous>, transform_indices = @transform_3, window_bounds = array<i64: 32, 64>}, {pipeline_mode = #tpu.pipeline_mode<synchronous>, transform_indices = @transform_4, window_bounds = array<i64: 32, 1>}, {pipeline_mode = #tpu.pipeline_mode<synchronous>, transform_indices = @transform_5, window_bounds = array<i64: 16, 32>}, {pipeline_mode = #tpu.pipeline_mode<synchronous>, transform_indices = @transform_6, window_bounds = array<i64: 16, 1>}, {pipeline_mode = #tpu.pipeline_mode<synchronous>, transform_indices = @transform_7, window_bounds = array<i64: 8, 16>}, {pipeline_mode = #tpu.pipeline_mode<synchronous>, transform_indices = @transform_8, window_bounds = array<i64: 8, 1>}, {pipeline_mode = #tpu.pipeline_mode<synchronous>, transform_indices = @transform_9, window_bounds = array<i64: 1, 8>}, {pipeline_mode = #tpu.pipeline_mode<synchronous>, transform_indices = @transform_10, window_bounds = array<i64: 1, 1>}, {transform_indices = @transform_11, window_bounds = array<i64: 1, 128>}]} {
    %c0 = arith.constant 0 : index
    %c0_0 = arith.constant 0 : index
    %0 = vector.load %arg1[%c0, %c0_0] : memref<128x16xf32, #tpu.memory_space<vmem>>, vector<128x16xf32>
    %1 = arith.truncf %0 : vector<128x16xf32> to vector<128x16xbf16>
    %c0_1 = arith.constant 0 : index
    %c0_2 = arith.constant 0 : index
    %2 = vector.load %arg2[%c0_1, %c0_2] : memref<64x16xbf16, #tpu.memory_space<vmem>>, vector<64x16xbf16>
    %cst = arith.constant dense<0.000000e+00> : vector<64x128xf32>
    %3 = tpu.matmul %2, %1, %cst {dimension_numbers = #tpu.dot_dimension_numbers<[1], [1], [0], [0], [0, 0, 1, 0], [], []>} : vector<64x16xbf16>, vector<128x16xbf16>, vector<64x128xf32> -> vector<64x128xf32>
    %c0_3 = arith.constant 0 : index
    %c0_4 = arith.constant 0 : index
    %4 = vector.load %arg3[%c0_3, %c0_4] : memref<64x1xf32, #tpu.memory_space<vmem>>, vector<64x1xf32>
    %5 = vector.broadcast %4 : vector<64x1xf32> to vector<64x128xf32>
    %6 = arith.addf %3, %5 : vector<64x128xf32>
    %cst_5 = arith.constant 0.000000e+00 : f32
    %7 = vector.broadcast %cst_5 : f32 to vector<64x128xf32>
    %8 = arith.maximumf %6, %7 : vector<64x128xf32>
    %c0_6 = arith.constant 0 : index
    %c0_7 = arith.constant 0 : index
    %9 = vector.load %arg4[%c0_6, %c0_7] : memref<32x64xbf16, #tpu.memory_space<vmem>>, vector<32x64xbf16>
    %10 = arith.truncf %8 : vector<64x128xf32> to vector<64x128xbf16>
    %cst_8 = arith.constant dense<0.000000e+00> : vector<32x128xf32>
    %11 = tpu.matmul %9, %10, %cst_8 {dimension_numbers = #tpu.dot_dimension_numbers<[1], [0], [0], [1], [0, 0, 1, 1], [], []>} : vector<32x64xbf16>, vector<64x128xbf16>, vector<32x128xf32> -> vector<32x128xf32>
    %c0_9 = arith.constant 0 : index
    %c0_10 = arith.constant 0 : index
    %12 = vector.load %arg5[%c0_9, %c0_10] : memref<32x1xf32, #tpu.memory_space<vmem>>, vector<32x1xf32>
    %13 = vector.broadcast %12 : vector<32x1xf32> to vector<32x128xf32>
    %14 = arith.addf %11, %13 : vector<32x128xf32>
    %cst_11 = arith.constant 0.000000e+00 : f32
    %15 = vector.broadcast %cst_11 : f32 to vector<32x128xf32>
    %16 = arith.maximumf %14, %15 : vector<32x128xf32>
    %c0_12 = arith.constant 0 : index
    %c0_13 = arith.constant 0 : index
    %17 = vector.load %arg6[%c0_12, %c0_13] : memref<16x32xbf16, #tpu.memory_space<vmem>>, vector<16x32xbf16>
    %18 = arith.truncf %16 : vector<32x128xf32> to vector<32x128xbf16>
    %cst_14 = arith.constant dense<0.000000e+00> : vector<16x128xf32>
    %19 = tpu.matmul %17, %18, %cst_14 {dimension_numbers = #tpu.dot_dimension_numbers<[1], [0], [0], [1], [0, 0, 1, 1], [], []>} : vector<16x32xbf16>, vector<32x128xbf16>, vector<16x128xf32> -> vector<16x128xf32>
    %c0_15 = arith.constant 0 : index
    %c0_16 = arith.constant 0 : index
    %20 = vector.load %arg7[%c0_15, %c0_16] : memref<16x1xf32, #tpu.memory_space<vmem>>, vector<16x1xf32>
    %21 = vector.broadcast %20 : vector<16x1xf32> to vector<16x128xf32>
    %22 = arith.addf %19, %21 : vector<16x128xf32>
    %cst_17 = arith.constant 0.000000e+00 : f32
    %23 = vector.broadcast %cst_17 : f32 to vector<16x128xf32>
    %24 = arith.maximumf %22, %23 : vector<16x128xf32>
    %c0_18 = arith.constant 0 : index
    %c0_19 = arith.constant 0 : index
    %25 = vector.load %arg8[%c0_18, %c0_19] : memref<8x16xbf16, #tpu.memory_space<vmem>>, vector<8x16xbf16>
    %26 = arith.truncf %24 : vector<16x128xf32> to vector<16x128xbf16>
    %cst_20 = arith.constant dense<0.000000e+00> : vector<8x128xf32>
    %27 = tpu.matmul %25, %26, %cst_20 {dimension_numbers = #tpu.dot_dimension_numbers<[1], [0], [0], [1], [0, 0, 1, 1], [], []>} : vector<8x16xbf16>, vector<16x128xbf16>, vector<8x128xf32> -> vector<8x128xf32>
    %c0_21 = arith.constant 0 : index
    %c0_22 = arith.constant 0 : index
    %28 = vector.load %arg9[%c0_21, %c0_22] : memref<8x1xf32, #tpu.memory_space<vmem>>, vector<8x1xf32>
    %29 = vector.broadcast %28 : vector<8x1xf32> to vector<8x128xf32>
    %30 = arith.addf %27, %29 : vector<8x128xf32>
    %cst_23 = arith.constant 0.000000e+00 : f32
    %31 = vector.broadcast %cst_23 : f32 to vector<8x128xf32>
    %32 = arith.maximumf %30, %31 : vector<8x128xf32>
    %c0_24 = arith.constant 0 : index
    %c0_25 = arith.constant 0 : index
    %33 = vector.load %arg10[%c0_24, %c0_25] : memref<1x8xbf16, #tpu.memory_space<vmem>>, vector<1x8xbf16>
    %34 = arith.truncf %32 : vector<8x128xf32> to vector<8x128xbf16>
    %cst_26 = arith.constant dense<0.000000e+00> : vector<1x128xf32>
    %35 = tpu.matmul %33, %34, %cst_26 {dimension_numbers = #tpu.dot_dimension_numbers<[1], [0], [0], [1], [0, 0, 1, 1], [], []>} : vector<1x8xbf16>, vector<8x128xbf16>, vector<1x128xf32> -> vector<1x128xf32>
    %c0_27 = arith.constant 0 : index
    %c0_28 = arith.constant 0 : index
    %36 = vector.load %arg11[%c0_27, %c0_28] : memref<1x1xf32, #tpu.memory_space<vmem>>, vector<1x1xf32>
    %37 = vector.broadcast %36 : vector<1x1xf32> to vector<1x128xf32>
    %38 = arith.addf %35, %37 : vector<1x128xf32>
    %39 = math.absf %38 : vector<1x128xf32>
    %cst_29 = arith.constant 0.000000e+00 : f32
    %40 = vector.broadcast %cst_29 : f32 to vector<1x128xf32>
    %41 = arith.subf %40, %39 : vector<1x128xf32>
    %42 = math.exp %41 : vector<1x128xf32>
    %cst_30 = arith.constant 1.000000e+00 : f32
    %43 = vector.broadcast %cst_30 : f32 to vector<1x128xf32>
    %44 = arith.addf %43, %42 : vector<1x128xf32>
    %45 = tpu.reciprocal %44 {approx = true} : vector<1x128xf32> -> vector<1x128xf32>
    %cst_31 = arith.constant 0.000000e+00 : f32
    %46 = vector.broadcast %cst_31 : f32 to vector<1x128xf32>
    %47 = arith.cmpf oge, %38, %46 : vector<1x128xf32>
    %48 = arith.mulf %42, %45 : vector<1x128xf32>
    %49 = arith.select %47, %45, %48 : vector<1x128xi1>, vector<1x128xf32>
    %c0_32 = arith.constant 0 : index
    %c0_33 = arith.constant 0 : index
    %50 = vector.load %arg12[%c0_32, %c0_33] : memref<1x128xf32, #tpu.memory_space<vmem>>, vector<1x128xf32>
    tpu.vector_store %arg12[%c0_32, %c0_33], %49 {strides = array<i32>} : memref<1x128xf32, #tpu.memory_space<vmem>>, vector<1x128xf32>,
    return
  }
  func.func @transform_0(%arg0: i32) -> (i32, i32) {
    %c0_i32 = arith.constant 0 : i32
    %c0_i32_0 = arith.constant 0 : i32
    return %arg0, %c0_i32 : i32, i32
  }
  func.func @transform_1(%arg0: i32) -> (i32, i32) {
    %c0_i32 = arith.constant 0 : i32
    %c0_i32_0 = arith.constant 0 : i32
    %c0_i32_1 = arith.constant 0 : i32
    return %c0_i32, %c0_i32_0 : i32, i32
  }
  func.func @transform_2(%arg0: i32) -> (i32, i32) {
    %c0_i32 = arith.constant 0 : i32
    %c0_i32_0 = arith.constant 0 : i32
    %c0_i32_1 = arith.constant 0 : i32
    return %c0_i32, %c0_i32_0 : i32, i32
  }
  func.func @transform_3(%arg0: i32) -> (i32, i32) {
    %c0_i32 = arith.constant 0 : i32
    %c0_i32_0 = arith.constant 0 : i32
    %c0_i32_1 = arith.constant 0 : i32
    return %c0_i32, %c0_i32_0 : i32, i32
  }
  func.func @transform_4(%arg0: i32) -> (i32, i32) {
    %c0_i32 = arith.constant 0 : i32
    %c0_i32_0 = arith.constant 0 : i32
    %c0_i32_1 = arith.constant 0 : i32
    return %c0_i32, %c0_i32_0 : i32, i32
  }
  func.func @transform_5(%arg0: i32) -> (i32, i32) {
    %c0_i32 = arith.constant 0 : i32
    %c0_i32_0 = arith.constant 0 : i32
    %c0_i32_1 = arith.constant 0 : i32
    return %c0_i32, %c0_i32_0 : i32, i32
  }
  func.func @transform_6(%arg0: i32) -> (i32, i32) {
    %c0_i32 = arith.constant 0 : i32
    %c0_i32_0 = arith.constant 0 : i32
    %c0_i32_1 = arith.constant 0 : i32
    return %c0_i32, %c0_i32_0 : i32, i32
  }
  func.func @transform_7(%arg0: i32) -> (i32, i32) {
    %c0_i32 = arith.constant 0 : i32
    %c0_i32_0 = arith.constant 0 : i32
    %c0_i32_1 = arith.constant 0 : i32
    return %c0_i32, %c0_i32_0 : i32, i32
  }
  func.func @transform_8(%arg0: i32) -> (i32, i32) {
    %c0_i32 = arith.constant 0 : i32
    %c0_i32_0 = arith.constant 0 : i32
    %c0_i32_1 = arith.constant 0 : i32
    return %c0_i32, %c0_i32_0 : i32, i32
  }
  func.func @transform_9(%arg0: i32) -> (i32, i32) {
    %c0_i32 = arith.constant 0 : i32
    %c0_i32_0 = arith.constant 0 : i32
    %c0_i32_1 = arith.constant 0 : i32
    return %c0_i32, %c0_i32_0 : i32, i32
  }
  func.func @transform_10(%arg0: i32) -> (i32, i32) {
    %c0_i32 = arith.constant 0 : i32
    %c0_i32_0 = arith.constant 0 : i32
    %c0_i32_1 = arith.constant 0 : i32
    return %c0_i32, %c0_i32_0 : i32, i32
  }
  func.func @transform_11(%arg0: i32) -> (i32, i32) {
    %c0_i32 = arith.constant 0 : i32
    %c0_i32_0 = arith.constant 0 : i32
    return %c0_i32, %arg0 : i32, i32
  }
}

</mosaic_0001>

<bundles_post_ra>
// kernel: waternet_forward.1
= control target key start
LH: loop header
LB: loop body
LE: loop exit
PB: predicated region body
PF: predicated region fallthrough
CT: control target
= control target key end

     0   :  { %s1223_s0 = inlined_call_operand.vmem [shape: f32[256,16], index: 0, kind: input, shape index: {}]   ;;  %s1224_s1 = inlined_call_operand.vmem [shape: bf16[64,16], index: 1, kind: input, shape index: {}]   ;;  %s1225_s2 = inlined_call_operand.vmem [shape: f32[64,1], index: 2, kind: input, shape index: {}]   ;;  %s1226_s3 = inlined_call_operand.vmem [shape: bf16[32,64], index: 3, kind: input, shape index: {}]   ;;  %s1227_s4 = inlined_call_operand.vmem [shape: f32[32,1], index: 4, kind: input, shape index: {}]   ;;  %s1228_s5 = inlined_call_operand.vmem [shape: bf16[16,32], index: 5, kind: input, shape index: {}]   ;;  %s1229_s6 = inlined_call_operand.vmem [shape: f32[16,1], index: 6, kind: input, shape index: {}]   ;;  %s1230_s7 = inlined_call_operand.vmem [shape: bf16[8,16], index: 7, kind: input, shape index: {}]   ;;  %s1231_s8 = inlined_call_operand.vmem [shape: f32[8,1], index: 8, kind: input, shape index: {}]   ;;  %s1232_s9 = inlined_call_operand.vmem [shape: bf16[1,8], index: 9, kind: input, shape index: {}]   ;;  %s1233_s10 = inlined_call_operand.<no memory space> [shape: f32[1,1], index: 10, kind: input, shape index: {}]   ;;  %s1234_s11 = inlined_call_operand.hbm [shape: f32[1,256], index: 11, kind: output, shape index: {}]  }
   0x1   :  { %v16_v0 = vstv %s1233_s10 }
   0x2   :  { %17 = vst [vmem:[#allocation2] sm:$0x1] %v16_v0 }
   0x3   :  { %18 = vsyncpa [#allocation4], 0 }
   0x4   :  { %20 = vsyncpa [#allocation4 + $0x1], 0  ;;  %s1036_s19 = smov 0   ;;  %s1038_s20 = smov 0  }
   0x5   :  { %s1040_s21 = smov 0   ;;  %s1042_s22 = smov 0  }
   0x6 LB: > { %s1057_s10 = sadd.s32 4294967295, %s970_s22   ;;  %s809_s23 = sadd.s32 4294967294, %s970_s22   ;;  %s970_s22 = sphi %s1042_s22, %s1240_s22   ;;  %s966_s21 = sphi %s1040_s21, %s1239_s21   ;;  %s962_s20 = sphi %s1038_s20, %s1238_s20   ;;  %s958_s19 = sphi %s1036_s19, %s1237_s19  }
   0x7   : > { %s1061_s24 = sadd.s32 1, %s970_s22   ;;  %s269_s25 = sadd.s32 1, %s966_s21 }
   0x8   : > { %s266_s26 = ssub.s32 %s970_s22, %s1061_s24  ;;  %p279_p0 = scmp.ne.s32.totalorder %s966_s21, %s962_s20 }
   0x9   : > { %p267_p1 = scmp.eq.s32.totalorder %s266_s26, 0  ;;  %p280_p2 = scmp.eq.s32.totalorder %s1057_s10, 1 }
   0xa   : > { %p285_p3 = scmp.ne.s32.totalorder %s962_s20, %s958_s19  ;;  %p286_p4 = scmp.eq.s32.totalorder %s809_s23, 1 }
   0xb   : > { %s1072_s27 = scalar_select %p267_p1, %s966_s21, %s269_s25  }
   0xc   : > { %p1074_p5 = por %p280_p2, %p279_p0  ;;  %p1078_p6 = por %p286_p4, %p285_p3 }
   0xd   : > { %p812_p7 = scmp.ge.s32.totalorder %s970_s22, 1  ;;  %p343_p8 = scmp.lt.s32.totalorder %s970_s22, 3 }
   0xf   : > { %p344_p9 = pnand %p812_p7, %p343_p8 }
  0x10   : > { %s813_s30 = sshll.u32 (!%p344_p9), %s1057_s10, 4  ;;  %s380_s26 = sand.u32 (!%p344_p9), 1, %s962_s20  }
  0x11   : > { %347 = sbr.rel (%p344_p9) target bundleno = 911 (0x38f), region = 64  ;;  %p383_p10 = scmp.lt.s32.totalorder (!%p344_p9), %s813_s30, 31 }
  0x12   : > { %s381_s13 = scalar_lea.vmem (!%p344_p9), [#allocation3], %s380_s26  ;;  %s742_s17 = scalar_lea.sflag (!%p344_p9), [#allocation4], %s380_s26 }
  0x13   : > { %s752_s14 = sshll.u32 (!%p344_p9), %s381_s13, 4  ;;  %s753_s14 = int_to_ptr.vmem [resolvable:$true] %s752_s14 }
  0x16   : > { %s1242_s30 = smov (!%p383_p10, %s813_s30), 31  ;;  %vm489_vm0 = vcmask 130048   ;;  %v427_v19 = vld [vmem:[%s1225_s2 + $0x30] sm:$0xff]  ;;  %v972_v21 = vmov 0   ;;  %v428_v25 = vld [vmem:[%s1225_s2 + $0x38] sm:$0xff]  ;;  %v425_v26 = vld [vmem:[%s1225_s2 + $0x20] sm:$0xff] }
  0x17   : > { %s814_s12 = sshll.u32 %s1242_s30, 3  ;;  %901 = vset.pattern.permute.xlu0 %v972_v21  ;;  %902 = vset.pattern.permute.xlu1 %v972_v21  ;;  %v426_v29 = vld [vmem:[%s1225_s2 + $0x28] sm:$0xff]  ;;  %v421_v32 = vld [vmem:[%s1225_s2] sm:$0xff]  ;;  %v574_v41 = vld [vmem:[%s1227_s4 + $0x18] sm:$0xff]  ;;  %vm605_vm1 = vcmask 523264   ;;  %vm656_vm2 = vcmask 261120  }
  0x18   : > { %s1088_s15 = scalar_lea.vmem %s1223_s0, %s814_s12  ;;  %461 = vperm.xlu0 %901, %v427_v19   ;;  %903 = vset.pattern.permute.xlu2 %v972_v21  ;;  %v422_v37 = vld [vmem:[%s1225_s2 + $0x8] sm:$0xff]  ;;  %v854_v40 = vld [vmem:[%s1224_s1] sm:$0xff]  ;;  %v423_v43 = vld [vmem:[%s1225_s2 + $0x10] sm:$0xff]  ;;  %vm714_vm3 = vcmask 1043456   ;;  %vm710_vm4 = vcmask 64512   ;;  %s750_s12 = scalar_lea.hbm %s1234_s11, %s1057_s10 }
  0x19   : > { %v403_v1 = vld [vmem:[%s1088_s15 + $0x70] sm:$0xff]  ;;  %v404_v2 = vld [vmem:[%s1088_s15 + $0x78] sm:$0xff]  ;;  %v401_v4 = vld [vmem:[%s1088_s15 + $0x60] sm:$0xff]  ;;  %451 = vperm.xlu1 %902, %v425_v26   ;;  %441 = vperm.xlu2 %903, %v423_v43   ;;  %s754_s16 = sshll.u32 %s750_s12, 4  ;;  %s755_s16 = int_to_ptr.hbm [resolvable:$true] %s754_s16 }
  0x1a   : > { %v412_v3 = vpack.c.bf16 %v404_v2, %v403_v1  ;;  %v402_v5 = vld [vmem:[%s1088_s15 + $0x68] sm:$0xff]  ;;  %v399_v9 = vld [vmem:[%s1088_s15 + $0x50] sm:$0xff]  ;;  %v400_v10 = vld [vmem:[%s1088_s15 + $0x58] sm:$0xff]  ;;  %s922_s18 = sshra.s32 %s755_s16, 4  ;;  %s923_s18 = int_to_ptr.hbm [resolvable:$true] %s922_s18 }
  0x1b   : > { %v411_v7 = vpack.c.bf16 %v402_v5, %v401_v4  ;;  %v410_v11 = vpack.c.bf16 %v400_v10, %v399_v9  ;;  %v397_v13 = vld [vmem:[%s1088_s15 + $0x40] sm:$0xff]  ;;  %v398_v14 = vld [vmem:[%s1088_s15 + $0x48] sm:$0xff]  ;;  %v395_v17 = vld [vmem:[%s1088_s15 + $0x30] sm:$0xff]  ;;  %s924_s23 = scalar_lea.hbm %s923_s18, 1  ;;  %p929_p0 = scmp.lt.s32.totalorder %s923_s18, %s1234_s11 }
  0x1c   : > { %v524_v6 = vsel %vm489_vm0, %v412_v3, 0  ;;  %v409_v15 = vpack.c.bf16 %v398_v14, %v397_v13  ;;  %v396_v18 = vld [vmem:[%s1088_s15 + $0x38] sm:$0xff]  ;;  %v393_v23 = vld [vmem:[%s1088_s15 + $0x20] sm:$0xff]  ;;  %v394_v24 = vld [vmem:[%s1088_s15 + $0x28] sm:$0xff]  ;;  %p925_p11 = scmp.ne.s32.totalorder %s923_s18, %s924_s23 }
  0x1d   : > { %526 = vmatpush.bf16.xpose.msra.mxu0 %v524_v6  ;;  %v521_v8 = vsel %vm489_vm0, %v411_v7, 0  ;;  %v518_v12 = vsel %vm489_vm0, %v410_v11, 0  ;;  %v408_v20 = vpack.c.bf16 %v396_v18, %v395_v17  ;;  %v407_v27 = vpack.c.bf16 %v394_v24, %v393_v23  ;;  %v391_v30 = vld [vmem:[%s1088_s15 + $0x10] sm:$0xff]  ;;  %v392_v31 = vld [vmem:[%s1088_s15 + $0x18] sm:$0xff]  ;;  %v389_v35 = vld [vmem:[%s1088_s15] sm:$0xff] }
  0x1e   : > { %v515_v16 = vsel %vm489_vm0, %v409_v15, 0  ;;  %v406_v33 = vpack.c.bf16 %v392_v31, %v391_v30  ;;  %v390_v36 = vld [vmem:[%s1088_s15 + $0x8] sm:$0xff]  ;;  %v639_v44 = vld [vmem:[%s1229_s6] sm:$0xff]  ;;  %v424_v46 = vld [vmem:[%s1225_s2 + $0x18] sm:$0xff]  ;;  %p926_p12 = pnand %p925_p11, %p1074_p5  ;;  %s928_s15 = scalar_lea.hbm %s1234_s11, 2 }
  0x1f   : > { %v512_v22 = vsel %vm489_vm0, %v408_v20, 0  ;;  %v509_v28 = vsel %vm489_vm0, %v407_v27, 0  ;;  %v405_v38 = vpack.c.bf16 %v390_v36, %v389_v35  ;;  %v855_v42 = vld [vmem:[%s1224_s1 + $0x8] sm:$0xff]  ;;  %v571_v45 = vld [vmem:[%s1227_s4] sm:$0xff]  ;;  %v856_v49 = vld [vmem:[%s1224_s1 + $0x10] sm:$0xff]  ;;  %p930_p1 = scmp.lt.s32.totalorder %s928_s15, %s924_s23 }
  0x20   : > { %466 = vperm.xlu0 %901, %v428_v25   ;;  %v506_v34 = vsel %vm489_vm0, %v406_v33, 0  ;;  %v703_v47 = vld [vmem:[#allocation2] sm:$0x1]  ;;  %v640_v48 = vld [vmem:[%s1229_s6 + $0x8] sm:$0xff]  ;;  %v573_v50 = vld [vmem:[%s1227_s4 + $0x10] sm:$0xff]  ;;  %p927_p13 = pneg %p926_p12 }
  0x21   : > { %456 = vperm.xlu1 %902, %v426_v29   ;;  %v503_v39 = vsel %vm489_vm0, %v405_v38, 0  ;;  %446 = vperm.xlu2 %903, %v424_v46   ;;  %v572_v51 = vld [vmem:[%s1227_s4 + $0x8] sm:$0xff]  ;;  %v857_v52 = vld [vmem:[%s1224_s1 + $0x18] sm:$0xff]  ;;  %v678_v53 = vld [vmem:[%s1231_s8] sm:$0xff]  ;;  %p931_p2 = por %p930_p1, %p929_p0 }
  0x22   : > { %v858_v26 = vld [vmem:[%s1226_s3] sm:$0xff]  ;;  %v859_v27 = vld [vmem:[%s1226_s3 + $0x8] sm:$0xff] }
  0x23   : > { %v860_v46 = vld [vmem:[%s1228_s5] sm:$0xff]  ;;  %p932_p3 = pnand %p931_p2, %p927_p13 }
  0x25   : > { %527 = vmatpush.bf16.xpose.msra.mxu0 %v521_v8 }
  0x28   : > { %431 = vperm.xlu0 %901, %v421_v32  }
  0x29   : > { %436 = vperm.xlu1 %902, %v422_v37   ;;  %587 = vperm.xlu2 %903, %v573_v50  }
  0x2d   : > { %528 = vmatpush.bf16.xpose.msra.mxu0 %v518_v12 }
  0x30   : > { %592 = vperm.xlu0 %901, %v574_v41  }
  0x31   : > { %577 = vperm.xlu1 %902, %v571_v45   ;;  %582 = vperm.xlu2 %903, %v572_v51  }
  0x35   : > { %529 = vmatpush.bf16.xpose.msra.mxu0 %v515_v16 }
  0x38   : > { %643 = vperm.xlu0 %901, %v639_v44  }
  0x39   : > { %648 = vperm.xlu1 %902, %v640_v48   ;;  %681 = vperm.xlu2 %903, %v678_v53  }
  0x3d   : > { %530 = vmatpush.bf16.xpose.msra.mxu0 %v512_v22 }
  0x40   : > { %706 = vperm.xlu0 %901, %v703_v47  }
  0x45   : > { %531 = vmatpush.bf16.xpose.msra.mxu0 %v509_v28 }
  0x4d   : > { %532 = vmatpush.bf16.xpose.msra.mxu0 %v506_v34 }
  0x55   : > { %533 = vmatpush.bf16.xpose.msra.mxu0 %v503_v39 }
  0x5c   : > { %831 = vmatmul.msk.bf16.vlgmr.msra.gmra.mxu0 %vm489_vm0, %v854_v40 }
  0x6c   : > { %832 = vmatmul.msk.bf16.gmra.mxu0 %vm489_vm0, %v855_v42 }
  0x73   : > { %v442_v62 = vpop.permute.xlu2 %441 }
  0x7b   : > { %v447_v6 = vpop.permute.xlu2 %446 }
  0x7c   : > { %833 = vmatmul.msk.bf16.gmra.mxu0 %vm489_vm0, %v856_v49 }
  0x83   : > { %v588_v30 = vpop.permute.xlu2 %587 }
  0x8a   : > { %v462_v61 = vpop.permute.xlu0 %461 }
  0x8b   : > { %v452_v60 = vpop.permute.xlu1 %451  ;;  %v583_v34 = vpop.permute.xlu2 %582 }
  0x8c   : > { %834 = vmatmul.msk.bf16.gmra.mxu0 %vm489_vm0, %v857_v52 }
  0x92   : > { %v467_v1 = vpop.permute.xlu0 %466 }
  0x93   : > { %v457_v0 = vpop.permute.xlu1 %456 }
  0x9a   : > { %v432_v16 = vpop.permute.xlu0 %431 }
  0x9b   : > { %v437_v13 = vpop.permute.xlu1 %436 }
  0xa2   : > { %v593_v32 = vpop.permute.xlu0 %592 }
  0xa3   : > { %v578_v38 = vpop.permute.xlu1 %577 }
  0xaa   : > { %v644_v48 = vpop.permute.xlu0 %643 }
  0xab   : > { %v649_v50 = vpop.permute.xlu1 %648 }
  0xd9   : > { %v535_v54 = vpop.f32.mrf.mxu0 }
  0xda   : > { %v536_v20 = vadd.f32 %v535_v54, %v432_v16 }
  0xdc   : > { %v555_v24 = vmax.f32 %v536_v20, 0.0 }
  0xe1   : > { %v537_v55 = vpop.f32.mrf.mxu0 }
  0xe2   : > { %v538_v17 = vadd.f32 %v537_v55, %v437_v13 }
  0xe4   : > { %v556_v22 = vmax.f32 %v538_v17, 0.0 }
  0xe6   : > { %v567_v25 = vpack.c.bf16 %v556_v22, %v555_v24 }
  0xe9   : > { %v540_v56 = vpop.f32.mrf.mxu0 }
  0xea   : > { %v541_v14 = vadd.f32 %v540_v56, %v442_v62  ;;  %v676_v56 = vld [vmem:[%s1230_s7] sm:$0xf] }
  0xec   : > { %v557_v21 = vmax.f32 %v541_v14, 0.0 }
  0xf1   : > { %v542_v57 = vpop.f32.mrf.mxu0 }
  0xf2   : > { %v543_v10 = vadd.f32 %v542_v57, %v447_v6  ;;  %v682_v57 = vpop.permute.xlu2 %681 }
  0xf4   : > { %v558_v18 = vmax.f32 %v543_v10, 0.0 }
  0xf6   : > { %v568_v23 = vpack.c.bf16 %v558_v18, %v557_v21 }
  0xf9   : > { %v545_v58 = vpop.f32.mrf.mxu0 }
  0xfa   : > { %v546_v7 = vadd.f32 %v545_v58, %v452_v60 }
  0xfc   : > { %v559_v15 = vmax.f32 %v546_v7, 0.0 }
 0x101   : > { %v547_v59 = vpop.f32.mrf.mxu0 }
 0x102   : > { %v548_v4 = vadd.f32 %v547_v59, %v457_v0  ;;  %v701_v0 = vld [vmem:[%s1232_s9] sm:$0x1] }
 0x104   : > { %v560_v11 = vmax.f32 %v548_v4, 0.0 }
 0x106   : > { %v569_v19 = vpack.c.bf16 %v560_v11, %v559_v15 }
 0x109   : > { %v550_v63 = vpop.f32.mrf.mxu0 }
 0x10a   : > { %v551_v2 = vadd.f32 %v550_v63, %v462_v61 }
 0x10c   : > { %v561_v8 = vmax.f32 %v551_v2, 0.0 }
 0x111   : > { %v552_v3 = vpop.f32.mrf.mxu0 }
 0x112   : > { %v553_v5 = vadd.f32 %v552_v3, %v467_v1  ;;  %v707_v1 = vpop.permute.xlu0 %706 }
 0x113   : > { %v709_v2 = vperm.slane %v707_v1, 0 }
 0x114   : > { %v562_v9 = vmax.f32 %v553_v5, 0.0 }
 0x116   : > { %v570_v12 = vpack.c.bf16 %v562_v9, %v561_v8 }
 0x118   : > { %616 = vmatpush.bf16.msra.mxu1 %v570_v12 }
 0x11c   : > { %617 = vmatpush.bf16.msra.mxu1 %v569_v19 }
 0x120   : > { %618 = vmatpush.bf16.msra.mxu1 %v568_v23 }
 0x124   : > { %619 = vmatpush.bf16.msra.mxu1 %v567_v25 }
 0x127   : > { %843 = vmatmul.msk.bf16.vlgmr.msra.gmra.mxu1 %vm605_vm1, %v858_v26 }
 0x137   : > { %844 = vmatmul.msk.bf16.gmra.mxu1 %vm605_vm1, %v859_v27 }
 0x1a4   : > { %v621_v28 = vpop.f32.mrf.mxu1 }
 0x1a5   : > { %v622_v39 = vadd.f32 %v621_v28, %v578_v38 }
 0x1a7   : > { %v631_v44 = vmax.f32 %v622_v39, 0.0 }
 0x1ac   : > { %v623_v29 = vpop.f32.mrf.mxu1 }
 0x1ad   : > { %v624_v36 = vadd.f32 %v623_v29, %v583_v34 }
 0x1af   : > { %v632_v42 = vmax.f32 %v624_v36, 0.0 }
 0x1b1   : > { %v637_v45 = vpack.c.bf16 %v632_v42, %v631_v44 }
 0x1b4   : > { %v626_v31 = vpop.f32.mrf.mxu1 }
 0x1b5   : > { %v627_v33 = vadd.f32 %v626_v31, %v588_v30 }
 0x1b7   : > { %v633_v40 = vmax.f32 %v627_v33, 0.0 }
 0x1bc   : > { %v628_v35 = vpop.f32.mrf.mxu1 }
 0x1bd   : > { %v629_v37 = vadd.f32 %v628_v35, %v593_v32 }
 0x1bf   : > { %v634_v41 = vmax.f32 %v629_v37, 0.0 }
 0x1c1   : > { %v638_v43 = vpack.c.bf16 %v634_v41, %v633_v40 }
 0x1c3   : > { %666 = vmatpush.bf16.msra.mxu2 %v638_v43 }
 0x1c7   : > { %667 = vmatpush.bf16.msra.mxu2 %v637_v45 }
 0x1ca   : > { %849 = vmatmul.msk.bf16.vlgmr.msra.gmra.mxu2 %vm656_vm2, %v860_v46 }
 0x24d   : > { %v669_v47 = vpop.f32.mrf.mxu2 }
 0x24e   : > { %v670_v49 = vadd.f32 %v669_v47, %v644_v48 }
 0x250   : > { %v674_v53 = vmax.f32 %v670_v49, 0.0 }
 0x255   : > { %v671_v51 = vpop.f32.mrf.mxu2 }
 0x256   : > { %v672_v52 = vadd.f32 %v671_v51, %v649_v50 }
 0x258   : > { %v675_v54 = vmax.f32 %v672_v52, 0.0 }
 0x25a   : > { %v677_v55 = vpack.c.bf16 %v675_v54, %v674_v53 }
 0x25c   : > { %694 = vmatpush.bf16.msra.mxu3 %v677_v55 }
 0x25f   : > { %850 = vmatmul.msk.bf16.vlgmr.msra.gmra.mxu3 %vm489_vm0, %v676_v56 }
 0x2e2   : > { %v696_v58 = vpop.f32.mrf.mxu3 }
 0x2e3   : > { %v697_v59 = vadd.f32 %v696_v58, %v682_v57 }
 0x2e5   : > { %v700_v60 = vmax.f32 %v697_v59, 0.0 }
 0x2e7   : > { %v702_v61 = vpack.c.bf16 %v700_v60, %v700_v60 }
 0x2e9   : > { %v716_v62 = vsel %vm714_vm3, %v702_v61, 0 }
 0x2ea   : > { %v698_v63 = vpop.f32.mrf.mxu3  ;;  %725 = vmatpush.bf16.msrb.mxu3 %v716_v62 }
 0x2ed   : > { %851 = vmatmul.msk.bf16.vlgmr.msrb.gmra.mxu3 %vm710_vm4, %v701_v0 }
 0x370   : > { %v727_v3 = vpop.f32.mrf.mxu3 }
 0x371   : > { %v728_v4 = vadd.f32 %v727_v3, %v709_v2 }
 0x373   : > { %v731_v5 = vand.u32 2147483647, %v728_v4  ;;  %vm737_vm5 = vcmp.ge.f32.partialorder %v728_v4, 0.0 }
 0x375   : > { %v732_v6 = vsub.f32 0.0, %v731_v5 }
 0x377   : > { %v733_v7 = vmul.f32 1.442695, %v732_v6 }
 0x378   : > { %v729_v8 = vpop.f32.mrf.mxu3 }
 0x379   : > { %904 = vpow2.f32 %v733_v7 }
 0x37f   : > { %v905_v9 = vpop.eup %904 }
 0x380   : > { %v735_v10 = vadd.f32 1.0, %v905_v9 }
 0x382   : > { %906 = vrcp.f32 %v735_v10 }
 0x388   : > { %v907_v11 = vpop.eup %906 }
 0x389   : > { %v738_v12 = vmul.f32 %v907_v11, %v905_v9 }
 0x38b   : > { %v739_v13 = vsel %vm737_vm5, %v907_v11, %v738_v12 }
 0x38c   : > { %740 = vst [vmem:[%s381_s13] sm:$0x1] %v739_v13 }
 0x38d   : > { %935 = shalt.err (!%p932_p3)
}
 0x38e   : > { %861 = dma.vmem_to_hbm [thread:$0]  (%p1074_p5), %s753_s14, 16, %s755_s16, %s742_s17  }
 0x38f PF: > { %p867_p4 = scmp.ge.s32.totalorder %s970_s22, 2  ;;  %s766_s26 = sand.u32 1, %s958_s19  }
 0x390   : > { %s767_s13 = scalar_lea.sflag [#allocation4], %s766_s26 }
 0x391   : > { %p864_p7 = pnand %p867_p4, %p1078_p6 }
 0x393   : > { %p865_p8 = pneg %p864_p7 }
 0x395   : > { %953 = dma.done.wait (%p865_p8), %s767_s13, 16  }
 0x396   : > { %955 = vsyncadd (%p865_p8), %s767_s13, 4294967280  ;;  %p23_p9 = scmp.ge.s32.totalorder %s1061_s24, 4   ;;  %s1237_s19 = smov %s962_s20 }
 0x397   : > { %s1238_s20 = smov %s966_s21  ;;  %s1239_s21 = smov %s1072_s27 }
 0x398   : > { %s1240_s22 = smov %s1061_s24  ;;  %25 = sbr.rel (!%p23_p9) target bundleno = 6 (0x6), region = 99 }
 0x39d   :  { %772 = vsyncpa [#allocation4], 1 }
 0x39e   :  { %774 = vsyncpa [#allocation4 + $0x1], 1 }

</bundles_post_ra>
